<compile_context>
chip_gen: v6e
topology: v6e:2x2x1
jax: 0.10.0
libtpu: 0.0.40
codegen_flags: <defaults>
</compile_context>

<pallas_src>
import functools

import jax
import jax.numpy as jnp
from jax import lax
from jax.experimental import pallas as pl
from jax.experimental.pallas import tpu as pltpu


def _round_up(x, m):
    return ((x + m - 1) // m) * m


def _net_kernel(lens_ref,    # SMEM (Bp,) i32   scalar-prefetched seq_len
                seq_ref,     # VMEM (bb, T, H)  f32 features (batch tile)
                w_ref,       # VMEM (H, W)      packed transposed weights
                b_ref,       # VMEM (1, W)      packed biases
                alogit_ref,  # out  (bb, Cp)
                rlogit_ref,  # out  (bb, Rp)
                tattn_ref,   # out  (bb, T, Cp)
                *, C, Cp, R, Rp, bb):
    del R
    i = pl.program_id(0)
    feat = seq_ref[...]                                    # (bb, T, H)
    _, T, H = feat.shape
    W = 2 * Cp + 2 * Rp
    f32 = jnp.float32
    neg = f32(-1e30)

    # ---- single fused MXU matmul for all four heads -------------------------
    feat2 = feat.reshape(bb * T, H)                        # T padded to x8 -> free relayout
    allh = jnp.dot(feat2, w_ref[...],
                   preferred_element_type=f32)             # (bb*T, W)

    logit = (allh[:, 0:Cp] + b_ref[:, 0:Cp]).reshape(bb, T, Cp)   # attention logits
    afa = allh[:, Cp:2 * Cp].reshape(bb, T, Cp)                   # feat @ action^T
    fw3 = allh[:, 2 * Cp:W].reshape(bb, T, 2 * Rp)                # feat @ [r_attn^T | recipe^T]
    b_act = b_ref[:, Cp:2 * Cp]
    b_ratt = b_ref[:, 2 * Cp:2 * Cp + Rp]
    b_rec = b_ref[:, 2 * Cp + Rp:W]

    # ---- in-kernel sequence mask from prefetched seq_len (no mask DMA) ------
    base = i * bb
    b_iota = lax.broadcasted_iota(jnp.int32, (bb, T, 1), 0)
    t_iota = lax.broadcasted_iota(jnp.int32, (bb, T, 1), 1)
    lens_b = jnp.zeros((bb, T, 1), jnp.int32)
    for b in range(bb):                                    # bb <= 8 static unroll
        lens_b = jnp.where(b_iota == b, lens_ref[base + b], lens_b)
    maskb = t_iota < lens_b                                # (bb, T, 1) bool

    # ---- temporal attention: stable masked softmax over valid timesteps -----
    lm = jnp.where(maskb, logit, neg)                      # single select per element
    m = jnp.max(lm, axis=1, keepdims=True)                 # (bb, 1, Cp)
    e = jnp.where(maskb, jnp.exp(lm - m), f32(0.0))
    denom = jnp.maximum(jnp.sum(e, axis=1, keepdims=True), f32(1e-30))
    r = pl.reciprocal(denom, approx=True)                  # EUP
    r = r * (f32(2.0) - denom * r)                         # one Newton step (1e-4 parity)
    tattn = e * r                                          # (bb, T, Cp)
    tattn_ref[...] = tattn

    # ---- action logits: alogit[b,c] = sum_t tattn[b,t,c] * (feat @ A^T)[b,t,c]
    alogit_ref[...] = jnp.sum(tattn * afa, axis=1) + b_act          # (bb, Cp)

    # ---- recipe head via associativity: tattn_b^T @ (feat_b @ [Ra^T|Rm^T]) ---
    c_valid = lax.broadcasted_iota(jnp.int32, (Cp, 1), 0) < C       # mask padded classes
    row_iota = lax.broadcasted_iota(jnp.int32, (bb, Rp), 0)
    rlogit = jnp.zeros((bb, Rp), f32)
    for b in range(bb):                                    # bb <= 8 static unroll
        comb = lax.dot_general(tattn[b], fw3[b], (((0,), (0,)), ((), ())),
                               preferred_element_type=f32)          # (Cp, 2*Rp)
        ral = jnp.where(c_valid, comb[:, 0:Rp] + b_ratt, neg)       # recipe-attn logits
        afr = comb[:, Rp:2 * Rp]
        m2 = jnp.max(ral, axis=0, keepdims=True)                    # (1, Rp)
        e2 = jnp.where(c_valid, jnp.exp(ral - m2), f32(0.0))
        d2 = jnp.maximum(jnp.sum(e2, axis=0, keepdims=True), f32(1e-30))
        r2 = pl.reciprocal(d2, approx=True)
        r2 = r2 * (f32(2.0) - d2 * r2)
        ratn = e2 * r2                                              # softmax over classes
        row = jnp.sum(ratn * afr, axis=0, keepdims=True) + b_rec    # (1, Rp)
        rlogit = jnp.where(row_iota == b, row, rlogit)
    rlogit_ref[...] = rlogit                               # single full-block store


def net_forward(seq, seq_len, params):
    """seq: (B, T, H) f32; seq_len: (B,) i32; params: torch-layout f32 arrays."""
    B, T, H = seq.shape
    C = params["action_matrix"].shape[0]
    R = params["recipe_matrix"].shape[0]
    LANES = 128
    Cp = _round_up(C, LANES)
    Rp = _round_up(R, LANES)
    W = 2 * Cp + 2 * Rp
    f32 = jnp.float32

    # Keep B*T rows sublane-aligned and pick a batch tile: whole batch when
    # small, 8-row tiles otherwise (v7x megacore parallelism + bounded VMEM).
    Tp = _round_up(T, 8)
    bb = B if B <= 8 else 8
    Bp = _round_up(B, bb)
    nb = Bp // bb

    def pad_w(mat, width):                     # (n, H) torch layout -> (H, width)
        mt = mat.astype(f32).T
        return jnp.pad(mt, ((0, 0), (0, width - mt.shape[1])))

    def pad_b(vec, width):                     # any shape with n entries -> (1, width)
        v = vec.astype(f32).reshape(1, -1)
        return jnp.pad(v, ((0, 0), (0, width - v.shape[1])))

    w_slab = jnp.concatenate([
        pad_w(params["attn_w"], Cp),
        pad_w(params["action_matrix"], Cp),
        pad_w(params["recipe_attention_matrix"], Rp),
        pad_w(params["recipe_matrix"], Rp)], axis=1)                 # (H, W)
    b_slab = jnp.concatenate([
        pad_b(params["attn_b"], Cp),
        pad_b(params["action_bias"], Cp),
        pad_b(params["recipe_attention_bias"], Rp),
        pad_b(params["recipe_bias"], Rp)], axis=1)                   # (1, W)

    seq_p = jnp.pad(seq.astype(f32), ((0, Bp - B), (0, Tp - T), (0, 0)))
    lens_p = jnp.pad(seq_len.astype(jnp.int32), (0, Bp - B))

    # Conservative per-step VMEM budget (double-buffered blocks + intermediates),
    # explicit and capped at 48 MiB so it also fits v7x's 64 MiB VMEM.
    block_bytes = 4 * (bb * Tp * H + H * W + W + bb * Tp * Cp + bb * (Cp + Rp))
    interm_bytes = 4 * bb * Tp * (W + 3 * Cp + 2 * Rp)
    vmem_limit = int(min(max(2 * block_bytes + interm_bytes + (4 << 20), 16 << 20),
                         48 << 20))

    kernel = functools.partial(_net_kernel, C=C, Cp=Cp, R=R, Rp=Rp, bb=bb)

    alogit_p, rlogit_p, tattn_p = pl.pallas_call(
        kernel,
        out_shape=(
            jax.ShapeDtypeStruct((Bp, Cp), f32),
            jax.ShapeDtypeStruct((Bp, Rp), f32),
            jax.ShapeDtypeStruct((Bp, Tp, Cp), f32),
        ),
        grid_spec=pltpu.PrefetchScalarGridSpec(
            num_scalar_prefetch=1,                 # seq_len -> SMEM
            grid=(nb,),
            in_specs=[
                pl.BlockSpec((bb, Tp, H), lambda i, lens: (i, 0, 0)),   # seq tile
                pl.BlockSpec((H, W), lambda i, lens: (0, 0)),           # packed weights
                pl.BlockSpec((1, W), lambda i, lens: (0, 0)),           # packed biases
            ],
            out_specs=(
                pl.BlockSpec((bb, Cp), lambda i, lens: (i, 0)),         # action logits
                pl.BlockSpec((bb, Rp), lambda i, lens: (i, 0)),         # recipe logits
                pl.BlockSpec((bb, Tp, Cp), lambda i, lens: (i, 0, 0)),  # temporal attention
            ),
        ),
        compiler_params=pltpu.CompilerParams(
            dimension_semantics=("parallel",),
            vmem_limit_bytes=vmem_limit),
    )(lens_p, seq_p, w_slab, b_slab)

    return alogit_p[:B, :C], rlogit_p[:B, :R], tattn_p[:B, :T, :C]


# ------------------------------ test harness --------------------------------

def _xavier_normal(key, shape, fan_in, fan_out):
    std = (2.0 / (fan_in + fan_out)) ** 0.5
    return std * jax.random.normal(key, shape, dtype=jnp.float32)


def make_params(key, input_dim, n_classes, n_recipe):
    H, C, R = input_dim, n_classes, n_recipe
    ks = jax.random.split(key, 8)
    return {
        # action_attention_layer: Linear(H, C) weight in torch (out, in) layout.
        "attn_w": _xavier_normal(ks[0], (C, H), H, C),
        "attn_b": _xavier_normal(ks[1], (1, C), 1, C),
        "action_matrix": _xavier_normal(ks[2], (C, H), H, C),
        "action_bias": _xavier_normal(ks[3], (1, C), 1, C),
        "recipe_attention_matrix": _xavier_normal(ks[4], (R, H), H, R),
        "recipe_attention_bias": _xavier_normal(ks[5], (1, R, 1), R, 1),
        "recipe_matrix": _xavier_normal(ks[6], (R, H), H, R),
        "recipe_bias": _xavier_normal(ks[7], (1, R), 1, R),
    }


def reference_forward(seq, seq_len, params):
    """Pure-JAX reference matching the PyTorch forward (no_gru=True)."""
    B, T, H = seq.shape
    P = jax.lax.Precision.HIGHEST
    logit = jnp.einsum("bth,ch->btc", seq, params["attn_w"],
                       precision=P) + params["attn_b"]
    mask = (jnp.arange(T)[None, :] < seq_len[:, None]).astype(jnp.float32)[..., None]
    exp_logit = jnp.exp(logit) * mask
    tattn = exp_logit / exp_logit.sum(axis=1, keepdims=True)            # (B,T,C)
    action_feature = jnp.einsum("btc,bth->bch", tattn, seq, precision=P)
    action_logit = jnp.einsum("bch,ch->bc", action_feature,
                              params["action_matrix"],
                              precision=P) + params["action_bias"]
    ratn = (jnp.einsum("bch,rh->brc", action_feature,
                       params["recipe_attention_matrix"], precision=P)
            + params["recipe_attention_bias"])                          # (B,R,C)
    ratn = jax.nn.softmax(ratn, axis=2)
    recipe_feature = jnp.einsum("brc,bch->brh", ratn, action_feature, precision=P)
    recipe_logit = jnp.einsum("brh,rh->br", recipe_feature,
                              params["recipe_matrix"],
                              precision=P) + params["recipe_bias"]
    return action_logit, recipe_logit, tattn


if __name__ == "__main__":
    B, T, H = 2, 8, 32          # batch, seq, hidden (= input_dim since no_gru)
    C, R = 8, 4                 # n_classes, n_recipe

    key = jax.random.PRNGKey(0)
    k_seq, k_par = jax.random.split(key)
    seq = jax.random.normal(k_seq, (B, T, H), dtype=jnp.float32)
    seq_len = jnp.array([T, 5], dtype=jnp.int32)
    params = make_params(k_par, H, C, R)

    action_logit, recipe_logit, tattn = net_forward(seq, seq_len, params)
    jax.block_until_ready((action_logit, recipe_logit, tattn))

    ref_a, ref_r, ref_t = reference_forward(seq, seq_len, params)
    assert jnp.allclose(action_logit, ref_a, rtol=1e-4, atol=1e-4), \
        float(jnp.abs(action_logit - ref_a).max())
    assert jnp.allclose(recipe_logit, ref_r, rtol=1e-4, atol=1e-4), \
        float(jnp.abs(recipe_logit - ref_r).max())
    assert jnp.allclose(tattn, ref_t, rtol=1e-4, atol=1e-4), \
        float(jnp.abs(tattn - ref_t).max())

    print("KERNEL_OK")
</pallas_src>

<mosaic_0001>
module attributes {stable_mosaic.version = 11 : i64} {
  func.func @_net_kernel(%arg0: i32, %arg1: memref<2xi32, #tpu.memory_space<smem>>, %arg2: memref<2x8x32xf32, #tpu.memory_space<vmem>>, %arg3: memref<32x512xf32, #tpu.memory_space<vmem>>, %arg4: memref<1x512xf32, #tpu.memory_space<vmem>>, %arg5: memref<2x128xf32, #tpu.memory_space<vmem>>, %arg6: memref<2x128xf32, #tpu.memory_space<vmem>>, %arg7: memref<2x8x128xf32, #tpu.memory_space<vmem>>) attributes {dimension_semantics = [#tpu.dimension_semantics<parallel>], iteration_bounds = array<i64: 1>, scalar_prefetch = 1 : i64, scratch_operands = 0 : i64, tpu.core_type = #tpu.core_type<tc>, window_params = [{transform_indices = @transform_0, window_bounds = array<i64: 2, 8, 32>}, {pipeline_mode = #tpu.pipeline_mode<synchronous>, transform_indices = @transform_1, window_bounds = array<i64: 32, 512>}, {pipeline_mode = #tpu.pipeline_mode<synchronous>, transform_indices = @transform_2, window_bounds = array<i64: 1, 512>}, {transform_indices = @transform_3, window_bounds = array<i64: 2, 128>}, {transform_indices = @transform_4, window_bounds = array<i64: 2, 128>}, {transform_indices = @transform_5, window_bounds = array<i64: 2, 8, 128>}]} {
    %c0 = arith.constant 0 : index
    %c0_0 = arith.constant 0 : index
    %c0_1 = arith.constant 0 : index
    %0 = vector.load %arg2[%c0, %c0_0, %c0_1] : memref<2x8x32xf32, #tpu.memory_space<vmem>>, vector<2x8x32xf32>
    %1 = vector.shape_cast %0 : vector<2x8x32xf32> to vector<16x32xf32>
    %c0_2 = arith.constant 0 : index
    %c0_3 = arith.constant 0 : index
    %2 = vector.load %arg3[%c0_2, %c0_3] : memref<32x512xf32, #tpu.memory_space<vmem>>, vector<32x512xf32>
    %cst = arith.constant dense<0.000000e+00> : vector<16x512xf32>
    %3 = tpu.matmul %1, %2, %cst {dimension_numbers = #tpu.dot_dimension_numbers<[1], [0], [0], [1], [0, 0, 1, 1], [], []>} : vector<16x32xf32>, vector<32x512xf32>, vector<16x512xf32> -> vector<16x512xf32>
    %4 = vector.extract_strided_slice %3 {offsets = [0, 0], sizes = [16, 128], strides = [1, 1]} : vector<16x512xf32> to vector<16x128xf32>
    %c0_4 = arith.constant 0 : index
    %c0_5 = arith.constant 0 : index
    %5 = vector.load %arg4[%c0_4, %c0_5] : memref<1x512xf32, #tpu.memory_space<vmem>>, vector<1x128xf32>
    %6 = vector.broadcast %5 : vector<1x128xf32> to vector<16x128xf32>
    %7 = arith.addf %4, %6 : vector<16x128xf32>
    %8 = vector.shape_cast %7 : vector<16x128xf32> to vector<2x8x128xf32>
    %9 = vector.extract_strided_slice %3 {offsets = [0, 128], sizes = [16, 128], strides = [1, 1]} : vector<16x512xf32> to vector<16x128xf32>
    %10 = vector.shape_cast %9 : vector<16x128xf32> to vector<2x8x128xf32>
    %11 = vector.extract_strided_slice %3 {offsets = [0, 256], sizes = [16, 256], strides = [1, 1]} : vector<16x512xf32> to vector<16x256xf32>
    %12 = vector.shape_cast %11 : vector<16x256xf32> to vector<2x8x256xf32>
    %c0_6 = arith.constant 0 : index
    %c128 = arith.constant 128 : index
    %13 = vector.load %arg4[%c0_6, %c128] : memref<1x512xf32, #tpu.memory_space<vmem>>, vector<1x128xf32>
    %c0_7 = arith.constant 0 : index
    %c256 = arith.constant 256 : index
    %14 = vector.load %arg4[%c0_7, %c256] : memref<1x512xf32, #tpu.memory_space<vmem>>, vector<1x128xf32>
    %c0_8 = arith.constant 0 : index
    %c384 = arith.constant 384 : index
    %15 = vector.load %arg4[%c0_8, %c384] : memref<1x512xf32, #tpu.memory_space<vmem>>, vector<1x128xf32>
    %c2_i32 = arith.constant 2 : i32
    %16 = arith.muli %arg0, %c2_i32 : i32
    %17 = tpu.iota {dimensions = array<i32: 0>} : vector<2x8x1xi32>
    %18 = tpu.iota {dimensions = array<i32: 1>} : vector<2x8x1xi32>
    %c0_i32 = arith.constant 0 : i32
    %19 = vector.broadcast %c0_i32 : i32 to vector<2x8x1xi32>
    %c0_i32_9 = arith.constant 0 : i32
    %20 = vector.broadcast %c0_i32_9 : i32 to vector<2x8x1xi32>
    %21 = arith.cmpi eq, %17, %20 : vector<2x8x1xi32>
    %c0_i32_10 = arith.constant 0 : i32
    %22 = arith.addi %16, %c0_i32_10 : i32
    %23 = arith.index_cast %22 : i32 to index
    %24 = memref.load %arg1[%23] : memref<2xi32, #tpu.memory_space<smem>>
    %25 = vector.broadcast %24 : i32 to vector<2x8x1xi32>
    %26 = arith.select %21, %25, %19 : vector<2x8x1xi1>, vector<2x8x1xi32>
    %c1_i32 = arith.constant 1 : i32
    %27 = vector.broadcast %c1_i32 : i32 to vector<2x8x1xi32>
    %28 = arith.cmpi eq, %17, %27 : vector<2x8x1xi32>
    %c1_i32_11 = arith.constant 1 : i32
    %29 = arith.addi %16, %c1_i32_11 : i32
    %30 = arith.index_cast %29 : i32 to index
    %31 = memref.load %arg1[%30] : memref<2xi32, #tpu.memory_space<smem>>
    %32 = vector.broadcast %31 : i32 to vector<2x8x1xi32>
    %33 = arith.select %28, %32, %26 : vector<2x8x1xi1>, vector<2x8x1xi32>
    %34 = arith.cmpi slt, %18, %33 : vector<2x8x1xi32>
    %cst_12 = arith.constant -1.000000e+30 : f32
    %35 = vector.shape_cast %34 : vector<2x8x1xi1> to vector<2x8x1xi1>
    %36 = vector.broadcast %35 : vector<2x8x1xi1> to vector<2x8x128xi1>
    %37 = vector.broadcast %cst_12 : f32 to vector<2x8x128xf32>
    %38 = arith.select %36, %8, %37 : vector<2x8x128xi1>, vector<2x8x128xf32>
    %cst_13 = arith.constant dense<0xFF800000> : vector<2x128xf32>
    %39 = vector.multi_reduction <maximumf>, %38, %cst_13 [1] : vector<2x8x128xf32> to vector<2x128xf32>
    %40 = vector.shape_cast %39 : vector<2x128xf32> to vector<2x1x128xf32>
    %41 = vector.broadcast %40 : vector<2x1x128xf32> to vector<2x8x128xf32>
    %42 = arith.subf %38, %41 : vector<2x8x128xf32>
    %43 = math.exp %42 : vector<2x8x128xf32>
    %cst_14 = arith.constant 0.000000e+00 : f32
    %44 = vector.shape_cast %34 : vector<2x8x1xi1> to vector<2x8x1xi1>
    %45 = vector.broadcast %44 : vector<2x8x1xi1> to vector<2x8x128xi1>
    %46 = vector.broadcast %cst_14 : f32 to vector<2x8x128xf32>
    %47 = arith.select %45, %43, %46 : vector<2x8x128xi1>, vector<2x8x128xf32>
    %cst_15 = arith.constant dense<0.000000e+00> : vector<2x128xf32>
    %48 = vector.multi_reduction <add>, %47, %cst_15 [1] : vector<2x8x128xf32> to vector<2x128xf32>
    %49 = vector.shape_cast %48 : vector<2x128xf32> to vector<2x1x128xf32>
    %cst_16 = arith.constant 1.000000e-30 : f32
    %50 = vector.broadcast %cst_16 : f32 to vector<2x1x128xf32>
    %51 = arith.maximumf %49, %50 : vector<2x1x128xf32>
    %52 = tpu.reciprocal %51 {approx = true} : vector<2x1x128xf32> -> vector<2x1x128xf32>
    %53 = arith.mulf %51, %52 : vector<2x1x128xf32>
    %cst_17 = arith.constant 2.000000e+00 : f32
    %54 = vector.broadcast %cst_17 : f32 to vector<2x1x128xf32>
    %55 = arith.subf %54, %53 : vector<2x1x128xf32>
    %56 = arith.mulf %52, %55 : vector<2x1x128xf32>
    %57 = vector.broadcast %56 : vector<2x1x128xf32> to vector<2x8x128xf32>
    %58 = arith.mulf %47, %57 : vector<2x8x128xf32>
    %c0_18 = arith.constant 0 : index
    %c0_19 = arith.constant 0 : index
    %c0_20 = arith.constant 0 : index
    %59 = vector.load %arg7[%c0_18, %c0_19, %c0_20] : memref<2x8x128xf32, #tpu.memory_space<vmem>>, vector<2x8x128xf32>
    tpu.vector_store %arg7[%c0_18, %c0_19, %c0_20], %58 {strides = array<i32>} : memref<2x8x128xf32, #tpu.memory_space<vmem>>, vector<2x8x128xf32>,
    %60 = arith.mulf %58, %10 : vector<2x8x128xf32>
    %cst_21 = arith.constant dense<0.000000e+00> : vector<2x128xf32>
    %61 = vector.multi_reduction <add>, %60, %cst_21 [1] : vector<2x8x128xf32> to vector<2x128xf32>
    %62 = vector.broadcast %13 : vector<1x128xf32> to vector<2x128xf32>
    %63 = arith.addf %61, %62 : vector<2x128xf32>
    %c0_22 = arith.constant 0 : index
    %c0_23 = arith.constant 0 : index
    %64 = vector.load %arg5[%c0_22, %c0_23] : memref<2x128xf32, #tpu.memory_space<vmem>>, vector<2x128xf32>
    tpu.vector_store %arg5[%c0_22, %c0_23], %63 {strides = array<i32>} : memref<2x128xf32, #tpu.memory_space<vmem>>, vector<2x128xf32>,
    %65 = tpu.iota {dimensions = array<i32: 0>} : vector<128x1xi32>
    %c8_i32 = arith.constant 8 : i32
    %66 = vector.broadcast %c8_i32 : i32 to vector<128x1xi32>
    %67 = arith.cmpi slt, %65, %66 : vector<128x1xi32>
    %68 = tpu.iota {dimensions = array<i32: 0>} : vector<2x128xi32>
    %cst_24 = arith.constant 0.000000e+00 : f32
    %69 = vector.broadcast %cst_24 : f32 to vector<2x128xf32>
    %70 = vector.extract_strided_slice %58 {offsets = [0, 0, 0], sizes = [1, 8, 128], strides = [1, 1, 1]} : vector<2x8x128xf32> to vector<1x8x128xf32>
    %71 = vector.shape_cast %70 : vector<1x8x128xf32> to vector<8x128xf32>
    %72 = vector.extract_strided_slice %12 {offsets = [0, 0, 0], sizes = [1, 8, 256], strides = [1, 1, 1]} : vector<2x8x256xf32> to vector<1x8x256xf32>
    %73 = vector.shape_cast %72 : vector<1x8x256xf32> to vector<8x256xf32>
    %cst_25 = arith.constant dense<0.000000e+00> : vector<128x256xf32>
    %74 = tpu.matmul %71, %73, %cst_25 {dimension_numbers = #tpu.dot_dimension_numbers<[0], [0], [1], [1], [0, 1, 1, 1], [], []>} : vector<8x128xf32>, vector<8x256xf32>, vector<128x256xf32> -> vector<128x256xf32>
    %75 = vector.extract_strided_slice %74 {offsets = [0, 0], sizes = [128, 128], strides = [1, 1]} : vector<128x256xf32> to vector<128x128xf32>
    %76 = vector.broadcast %14 : vector<1x128xf32> to vector<128x128xf32>
    %77 = arith.addf %75, %76 : vector<128x128xf32>
    %cst_26 = arith.constant -1.000000e+30 : f32
    %78 = vector.shape_cast %67 : vector<128x1xi1> to vector<128x1xi1>
    %79 = vector.broadcast %78 : vector<128x1xi1> to vector<128x128xi1>
    %80 = vector.broadcast %cst_26 : f32 to vector<128x128xf32>
    %81 = arith.select %79, %77, %80 : vector<128x128xi1>, vector<128x128xf32>
    %82 = vector.extract_strided_slice %74 {offsets = [0, 128], sizes = [128, 128], strides = [1, 1]} : vector<128x256xf32> to vector<128x128xf32>
    %cst_27 = arith.constant dense<0xFF800000> : vector<128xf32>
    %83 = vector.multi_reduction <maximumf>, %81, %cst_27 [0] : vector<128x128xf32> to vector<128xf32>
    %84 = vector.shape_cast %83 : vector<128xf32> to vector<1x128xf32>
    %85 = vector.broadcast %84 : vector<1x128xf32> to vector<128x128xf32>
    %86 = arith.subf %81, %85 : vector<128x128xf32>
    %87 = math.exp %86 : vector<128x128xf32>
    %cst_28 = arith.constant 0.000000e+00 : f32
    %88 = vector.shape_cast %67 : vector<128x1xi1> to vector<128x1xi1>
    %89 = vector.broadcast %88 : vector<128x1xi1> to vector<128x128xi1>
    %90 = vector.broadcast %cst_28 : f32 to vector<128x128xf32>
    %91 = arith.select %89, %87, %90 : vector<128x128xi1>, vector<128x128xf32>
    %cst_29 = arith.constant dense<0.000000e+00> : vector<128xf32>
    %92 = vector.multi_reduction <add>, %91, %cst_29 [0] : vector<128x128xf32> to vector<128xf32>
    %93 = vector.shape_cast %92 : vector<128xf32> to vector<1x128xf32>
    %cst_30 = arith.constant 1.000000e-30 : f32
    %94 = vector.broadcast %cst_30 : f32 to vector<1x128xf32>
    %95 = arith.maximumf %93, %94 : vector<1x128xf32>
    %96 = tpu.reciprocal %95 {approx = true} : vector<1x128xf32> -> vector<1x128xf32>
    %97 = arith.mulf %95, %96 : vector<1x128xf32>
    %cst_31 = arith.constant 2.000000e+00 : f32
    %98 = vector.broadcast %cst_31 : f32 to vector<1x128xf32>
    %99 = arith.subf %98, %97 : vector<1x128xf32>
    %100 = arith.mulf %96, %99 : vector<1x128xf32>
    %101 = vector.broadcast %100 : vector<1x128xf32> to vector<128x128xf32>
    %102 = arith.mulf %91, %101 : vector<128x128xf32>
    %103 = arith.mulf %102, %82 : vector<128x128xf32>
    %cst_32 = arith.constant dense<0.000000e+00> : vector<128xf32>
    %104 = vector.multi_reduction <add>, %103, %cst_32 [0] : vector<128x128xf32> to vector<128xf32>
    %105 = vector.shape_cast %104 : vector<128xf32> to vector<1x128xf32>
    %106 = arith.addf %105, %15 : vector<1x128xf32>
    %c0_i32_33 = arith.constant 0 : i32
    %107 = vector.broadcast %c0_i32_33 : i32 to vector<2x128xi32>
    %108 = arith.cmpi eq, %68, %107 : vector<2x128xi32>
    %109 = vector.shape_cast %106 : vector<1x128xf32> to vector<1x128xf32>
    %110 = vector.broadcast %109 : vector<1x128xf32> to vector<2x128xf32>
    %111 = arith.select %108, %110, %69 : vector<2x128xi1>, vector<2x128xf32>
    %112 = vector.extract_strided_slice %58 {offsets = [1, 0, 0], sizes = [1, 8, 128], strides = [1, 1, 1]} : vector<2x8x128xf32> to vector<1x8x128xf32>
    %113 = vector.shape_cast %112 : vector<1x8x128xf32> to vector<8x128xf32>
    %114 = vector.extract_strided_slice %12 {offsets = [1, 0, 0], sizes = [1, 8, 256], strides = [1, 1, 1]} : vector<2x8x256xf32> to vector<1x8x256xf32>
    %115 = vector.shape_cast %114 : vector<1x8x256xf32> to vector<8x256xf32>
    %cst_34 = arith.constant dense<0.000000e+00> : vector<128x256xf32>
    %116 = tpu.matmul %113, %115, %cst_34 {dimension_numbers = #tpu.dot_dimension_numbers<[0], [0], [1], [1], [0, 1, 1, 1], [], []>} : vector<8x128xf32>, vector<8x256xf32>, vector<128x256xf32> -> vector<128x256xf32>
    %117 = vector.extract_strided_slice %116 {offsets = [0, 0], sizes = [128, 128], strides = [1, 1]} : vector<128x256xf32> to vector<128x128xf32>
    %118 = vector.broadcast %14 : vector<1x128xf32> to vector<128x128xf32>
    %119 = arith.addf %117, %118 : vector<128x128xf32>
    %cst_35 = arith.constant -1.000000e+30 : f32
    %120 = vector.shape_cast %67 : vector<128x1xi1> to vector<128x1xi1>
    %121 = vector.broadcast %120 : vector<128x1xi1> to vector<128x128xi1>
    %122 = vector.broadcast %cst_35 : f32 to vector<128x128xf32>
    %123 = arith.select %121, %119, %122 : vector<128x128xi1>, vector<128x128xf32>
    %124 = vector.extract_strided_slice %116 {offsets = [0, 128], sizes = [128, 128], strides = [1, 1]} : vector<128x256xf32> to vector<128x128xf32>
    %cst_36 = arith.constant dense<0xFF800000> : vector<128xf32>
    %125 = vector.multi_reduction <maximumf>, %123, %cst_36 [0] : vector<128x128xf32> to vector<128xf32>
    %126 = vector.shape_cast %125 : vector<128xf32> to vector<1x128xf32>
    %127 = vector.broadcast %126 : vector<1x128xf32> to vector<128x128xf32>
    %128 = arith.subf %123, %127 : vector<128x128xf32>
    %129 = math.exp %128 : vector<128x128xf32>
    %cst_37 = arith.constant 0.000000e+00 : f32
    %130 = vector.shape_cast %67 : vector<128x1xi1> to vector<128x1xi1>
    %131 = vector.broadcast %130 : vector<128x1xi1> to vector<128x128xi1>
    %132 = vector.broadcast %cst_37 : f32 to vector<128x128xf32>
    %133 = arith.select %131, %129, %132 : vector<128x128xi1>, vector<128x128xf32>
    %cst_38 = arith.constant dense<0.000000e+00> : vector<128xf32>
    %134 = vector.multi_reduction <add>, %133, %cst_38 [0] : vector<128x128xf32> to vector<128xf32>
    %135 = vector.shape_cast %134 : vector<128xf32> to vector<1x128xf32>
    %cst_39 = arith.constant 1.000000e-30 : f32
    %136 = vector.broadcast %cst_39 : f32 to vector<1x128xf32>
    %137 = arith.maximumf %135, %136 : vector<1x128xf32>
    %138 = tpu.reciprocal %137 {approx = true} : vector<1x128xf32> -> vector<1x128xf32>
    %139 = arith.mulf %137, %138 : vector<1x128xf32>
    %cst_40 = arith.constant 2.000000e+00 : f32
    %140 = vector.broadcast %cst_40 : f32 to vector<1x128xf32>
    %141 = arith.subf %140, %139 : vector<1x128xf32>
    %142 = arith.mulf %138, %141 : vector<1x128xf32>
    %143 = vector.broadcast %142 : vector<1x128xf32> to vector<128x128xf32>
    %144 = arith.mulf %133, %143 : vector<128x128xf32>
    %145 = arith.mulf %144, %124 : vector<128x128xf32>
    %cst_41 = arith.constant dense<0.000000e+00> : vector<128xf32>
    %146 = vector.multi_reduction <add>, %145, %cst_41 [0] : vector<128x128xf32> to vector<128xf32>
    %147 = vector.shape_cast %146 : vector<128xf32> to vector<1x128xf32>
    %148 = arith.addf %147, %15 : vector<1x128xf32>
    %c1_i32_42 = arith.constant 1 : i32
    %149 = vector.broadcast %c1_i32_42 : i32 to vector<2x128xi32>
    %150 = arith.cmpi eq, %68, %149 : vector<2x128xi32>
    %151 = vector.shape_cast %148 : vector<1x128xf32> to vector<1x128xf32>
    %152 = vector.broadcast %151 : vector<1x128xf32> to vector<2x128xf32>
    %153 = arith.select %150, %152, %111 : vector<2x128xi1>, vector<2x128xf32>
    %c0_43 = arith.constant 0 : index
    %c0_44 = arith.constant 0 : index
    %154 = vector.load %arg6[%c0_43, %c0_44] : memref<2x128xf32, #tpu.memory_space<vmem>>, vector<2x128xf32>
    tpu.vector_store %arg6[%c0_43, %c0_44], %153 {strides = array<i32>} : memref<2x128xf32, #tpu.memory_space<vmem>>, vector<2x128xf32>,
    return
  }
  func.func @transform_0(%arg0: i32, %arg1: memref<2xi32, #tpu.memory_space<smem>>) -> (i32, i32, i32) {
    %c0_i32 = arith.constant 0 : i32
    %c0_i32_0 = arith.constant 0 : i32
    %c0_i32_1 = arith.constant 0 : i32
    return %arg0, %c0_i32, %c0_i32_0 : i32, i32, i32
  }
  func.func @transform_1(%arg0: i32, %arg1: memref<2xi32, #tpu.memory_space<smem>>) -> (i32, i32) {
    %c0_i32 = arith.constant 0 : i32
    %c0_i32_0 = arith.constant 0 : i32
    %c0_i32_1 = arith.constant 0 : i32
    return %c0_i32, %c0_i32_0 : i32, i32
  }
  func.func @transform_2(%arg0: i32, %arg1: memref<2xi32, #tpu.memory_space<smem>>) -> (i32, i32) {
    %c0_i32 = arith.constant 0 : i32
    %c0_i32_0 = arith.constant 0 : i32
    %c0_i32_1 = arith.constant 0 : i32
    return %c0_i32, %c0_i32_0 : i32, i32
  }
  func.func @transform_3(%arg0: i32, %arg1: memref<2xi32, #tpu.memory_space<smem>>) -> (i32, i32) {
    %c0_i32 = arith.constant 0 : i32
    %c0_i32_0 = arith.constant 0 : i32
    return %arg0, %c0_i32 : i32, i32
  }
  func.func @transform_4(%arg0: i32, %arg1: memref<2xi32, #tpu.memory_space<smem>>) -> (i32, i32) {
    %c0_i32 = arith.constant 0 : i32
    %c0_i32_0 = arith.constant 0 : i32
    return %arg0, %c0_i32 : i32, i32
  }
  func.func @transform_5(%arg0: i32, %arg1: memref<2xi32, #tpu.memory_space<smem>>) -> (i32, i32, i32) {
    %c0_i32 = arith.constant 0 : i32
    %c0_i32_0 = arith.constant 0 : i32
    %c0_i32_1 = arith.constant 0 : i32
    return %arg0, %c0_i32, %c0_i32_0 : i32, i32, i32
  }
}

</mosaic_0001>

<bundles_post_ra>
// kernel: tpu_custom_call.1
= control target key start
LH: loop header
LB: loop body
LE: loop exit
PB: predicated region body
PF: predicated region fallthrough
CT: control target
= control target key end

     0   :  { %s1523_s21 = smov [#allocation3]   ;;  %s1752_s0 = inlined_call_operand.hbm [shape: s32[2], index: 0, kind: input, shape index: {}]   ;;  %s1753_s1 = inlined_call_operand.hbm [shape: f32[2,8,32], index: 1, kind: input, shape index: {}]   ;;  %s1754_s2 = inlined_call_operand.hbm [shape: f32[32,512], index: 2, kind: input, shape index: {}]   ;;  %s1755_s3 = inlined_call_operand.vmem [shape: f32[1,512], index: 3, kind: input, shape index: {}]   ;;  %s1756_s4 = inlined_call_operand.hbm [shape: f32[2,128], index: 4, kind: output, shape index: {0}]   ;;  %s1757_s5 = inlined_call_operand.hbm [shape: f32[2,128], index: 5, kind: output, shape index: {1}]   ;;  %s1758_s6 = inlined_call_operand.hbm [shape: f32[2,8,128], index: 6, kind: output, shape index: {2}]  }
   0x1   :  { %13 = dma.hbm_to_smem %s1752_s0, 16, %s1523_s21, [#allocation2] }
   0x2   :  { %1513 = dma.done.wait [#allocation2], 16 }
   0x3   :  { %1514 = vsyncadd [#allocation2], 4294967280 }
   0x4   :  { %15 = sfence }
   0x5   :  { %16 = vsyncpa [#allocation5], 0 }
   0x6   :  { %17 = vsyncpa [#allocation8], 0 }
   0x7   :  { %18 = vsyncpa [#allocation6], 0 }
   0x8   :  { %19 = vsyncpa [#allocation11], 0  ;;  %s1524_s24 = smov [#allocation4]  }
   0x9   :  { %s25_s25 = sshll.u32 %s1524_s24, 4  ;;  %s26_s25 = int_to_ptr.vmem [resolvable:$true] %s25_s25 }
   0xa   :  { %s1421_s26 = scalar_lea.vmem %s26_s25, 256  ;;  %p1426_p1 = scmp.lt.s32.totalorder %s26_s25, %s26_s25 }
   0xb   :  { %p1422_p0 = scmp.ne.s32.totalorder %s26_s25, %s1421_s26  ;;  %p1427_p2 = scmp.lt.s32.totalorder %s1421_s26, %s1421_s26 }
   0xd   :  { %p1428_p3 = por %p1427_p2, %p1426_p1 }
   0xf   :  { %p1429_p4 = pnand %p1428_p3, %p1422_p0 }
  0x11   :  { %1432 = shalt.err (!%p1429_p4)
}
  0x12   :  { %s1525_s27 = smov 128   ;;  %s1526_s28 = smov 8  }
  0x13   :  { %31 = dma.hbm_to_vmem [thread:$0]  %s1753_s1, 256, %s26_s25, [#allocation5], %s1525_s27, %s1525_s27, %s1526_s28  }
  0x14   :  { %s1527_s30 = smov [#allocation7]  }
  0x15   :  { %s37_s7 = sshll.u32 %s1527_s30, 4  ;;  %s38_s7 = int_to_ptr.vmem [resolvable:$true] %s37_s7 }
  0x16   :  { %s1441_s8 = scalar_lea.vmem %s38_s7, 2048  ;;  %p1446_p6 = scmp.lt.s32.totalorder %s38_s7, %s38_s7 }
  0x17   :  { %p1442_p5 = scmp.ne.s32.totalorder %s38_s7, %s1441_s8  ;;  %p1447_p7 = scmp.lt.s32.totalorder %s1441_s8, %s1441_s8 }
  0x19   :  { %p1448_p8 = por %p1447_p7, %p1446_p6 }
  0x1b   :  { %p1449_p9 = pnand %p1448_p8, %p1442_p5 }
  0x1d   :  { %1452 = shalt.err (!%p1449_p9)
}
  0x1e   :  { %s1528_s9 = smov 512   ;;  %s1529_s10 = smov 32  }
  0x1f   :  { %43 = dma.hbm_to_vmem [thread:$0]  %s1754_s2, 2048, %s38_s7, [#allocation8], %s1528_s9, %s1528_s9, %s1529_s10  }
  0x20   :  { %1515 = dma.done.wait [#allocation5], 256  }
  0x21   :  { %1516 = vsyncadd [#allocation5], 4294967040 }
  0x22   :  { %1517 = dma.done.wait [#allocation8], 2048  }
  0x23   :  { %1518 = vsyncadd [#allocation8], 4294965248  ;;  %v1530_v0 = vmov 0.0   ;;  %v67_v1 = vld [vmem:[#allocation7 + $0x68] sm:$0xff]  ;;  %v66_v2 = vld [vmem:[#allocation7 + $0x60] sm:$0xff]  ;;  %vm70_vm0 = vcmask 261120   ;;  %v244_v19 = vlaneseq }
  0x24   :  { %141 = vmatprep.mubr.f32.mxu0 %v1530_v0  ;;  %218 = vmatprep.mubr.f32.mxu1 %v1530_v0  ;;  %v63_v3 = vld [vmem:[#allocation7 + $0x48] sm:$0xff]  ;;  %v62_v4 = vld [vmem:[#allocation7 + $0x40] sm:$0xff]  ;;  %v69_v7 = vld [vmem:[#allocation7 + $0x78] sm:$0xff]  ;;  %s246_s1 = sld [smem:[#allocation3]]  ;;  %vm330_vm3 = vcmask 1041409   ;;  %vm397_vm4 = vcmask 64512  }
  0x25   :  { %101 = vmatprep.subr.mxu0 %v67_v1  ;;  %v59_v5 = vld [vmem:[#allocation7 + $0x28] sm:$0xff]  ;;  %v58_v6 = vld [vmem:[#allocation7 + $0x20] sm:$0xff]  ;;  %v68_v8 = vld [vmem:[#allocation7 + $0x70] sm:$0xff]  ;;  %178 = vmatprep.subr.mxu1 %v69_v7  ;;  %s1343_s2 = sld [smem:[#allocation3 + $0x1]]  ;;  %v1591_v20 = vshrl.u32 %v244_v19, 7  ;;  %s1531_s19 = smov [#allocation9]  }
  0x26   :  { %102 = vmatpush1.msra.mxu0 %v66_v2  ;;  %v55_v9 = vld [vmem:[#allocation7 + $0x8] sm:$0xff]  ;;  %v65_v10 = vld [vmem:[#allocation7 + $0x58] sm:$0xff]  ;;  %v64_v11 = vld [vmem:[#allocation7 + $0x50] sm:$0xff]  ;;  %179 = vmatpush1.msra.mxu1 %v68_v8  ;;  %s1299_s20 = sshll.u32 %s1531_s19, 4  ;;  %s1300_s20 = int_to_ptr.vmem [resolvable:$true] %s1299_s20 }
  0x27   :  { %103 = vmatprep.subr.mxu0 %v63_v3  ;;  %v54_v12 = vld [vmem:[#allocation7] sm:$0xff]  ;;  %v61_v13 = vld [vmem:[#allocation7 + $0x38] sm:$0xff]  ;;  %v52_v14 = vld [vmem:[#allocation4] sm:$0xff]  ;;  %180 = vmatprep.subr.mxu1 %v65_v10  ;;  %s1453_s21 = scalar_lea.vmem %s1300_s20, 32  ;;  %p1458_p11 = scmp.lt.s32.totalorder %s1300_s20, %s1300_s20 }
  0x28   :  { %104 = vmatpush1.msra.mxu0 %v62_v4  ;;  %v60_v15 = vld [vmem:[#allocation7 + $0x30] sm:$0xff]  ;;  %181 = vmatpush1.msra.mxu1 %v64_v11  ;;  %v57_v16 = vld [vmem:[#allocation7 + $0x18] sm:$0xff]  ;;  %v1342_v22 = vld [vmem:[%s1755_s3] ss:$0 sm:$0xff]  ;;  %p1454_p10 = scmp.ne.s32.totalorder %s1300_s20, %s1453_s21  ;;  %p1459_p12 = scmp.lt.s32.totalorder %s1453_s21, %s1453_s21 }
  0x29   :  { %105 = vmatprep.subr.mxu0 %v59_v5  ;;  %182 = vmatprep.subr.mxu1 %v61_v13  ;;  %v56_v17 = vld [vmem:[#allocation7 + $0x10] sm:$0xff]  ;;  %v53_v18 = vld [vmem:[#allocation4 + $0x8] sm:$0xff] }
  0x2a   :  { %106 = vmatpush1.msra.mxu0 %v58_v6  ;;  %183 = vmatpush1.msra.mxu1 %v60_v15  ;;  %v247_v21 = vstv %s246_s1  ;;  %p1460_p13 = por %p1459_p12, %p1458_p11 }
  0x2b   :  { %107 = vmatprep.subr.mxu0 %v55_v9  ;;  %184 = vmatprep.subr.mxu1 %v57_v16  ;;  %vm1597_vm1 = vcmp.lt.s32.totalorder %v1591_v20, %v247_v21  ;;  %v250_v26 = vstv %s1343_s2 }
  0x2c   :  { %108 = vmatpush1.msra.mxu0 %v54_v12  ;;  %185 = vmatpush1.msra.mxu1 %v56_v17  ;;  %vm1604_vm2 = vcmp.lt.s32.totalorder %v1591_v20, %v250_v26  ;;  %p1461_p0 = pnand %p1460_p13, %p1454_p10 }
  0x2d   :  { %1338 = vmatmul.mubr.msk.f32.vlgmr.msra.gmra.mxu0 %vm70_vm0, %v52_v14  ;;  %1340 = vmatmul.mubr.msk.f32.vlgmr.msra.gmra.mxu1 %vm70_vm0, %v52_v14 }
  0x2e   :  { %147 = vmatprep.mubr.f32.mxu0 %v1530_v0  ;;  %224 = vmatprep.mubr.f32.mxu1 %v1530_v0 }
  0x31   :  { %1339 = vmatmul.mubr.msk.f32.gmra.mxu0 %vm70_vm0, %v53_v18  ;;  %1341 = vmatmul.mubr.msk.f32.gmra.mxu1 %vm70_vm0, %v53_v18 }
  0x32   :  { %510 = vmatprep.mubr.f32.mxu0 %v1530_v0  ;;  %992 = vmatprep.mubr.f32.mxu1 %v1530_v0 }
  0xed   :  { %v143_v23 = vpop.f32.mrf.mxu0  ;;  %v220_v32 = vpop.f32.mrf.mxu1 }
  0xee   :  { %v238_v25 = vadd.f32 %v1342_v22, %v143_v23 }
  0xef   :  { %v145_v27 = vpop.f32.mrf.mxu0  ;;  %v222_v35 = vpop.f32.mrf.mxu1 }
  0xf0   :  { %v257_v28 = vsel %vm1597_vm1, %v238_v25, -1e+30  ;;  %476 = vmatprep.subr.mxu0 %v222_v35 }
  0xf1   :  { %v259_v29 = vrot.slane %v257_v28, 4  ;;  %v149_v30 = vpop.f32.mrf.mxu0  ;;  %477 = vmatpush1.msra.mxu0 %v220_v32 }
  0xf2   :  { %v239_v33 = vadd.f32 %v1342_v22, %v149_v30 }
  0xf3   :  { %v260_v34 = vmax.f32 %v257_v28, %v259_v29  ;;  %v151_v18 = vpop.f32.mrf.mxu0 }
  0xf4   :  { %v258_v36 = vsel %vm1604_vm2, %v239_v33, -1e+30 }
  0xf5   :  { %v261_v37 = vrot.slane %v260_v34, 2  ;;  %v265_v38 = vrot.slane %v258_v36, 4 }
  0xf7   :  { %v262_v39 = vmax.f32 %v260_v34, %v261_v37  ;;  %v266_v40 = vmax.f32 %v258_v36, %v265_v38  ;;  %v226_v37 = vpop.f32.mrf.mxu1 }
  0xf9   :  { %v263_v41 = vrot.slane %v262_v39, 1  ;;  %v267_v42 = vrot.slane %v266_v40, 2  ;;  %v228_v38 = vpop.f32.mrf.mxu1 }
  0xfa   :  { %958 = vmatprep.subr.mxu1 %v228_v38 }
  0xfb   :  { %v264_v43 = vmax.f32 %v262_v39, %v263_v41  ;;  %v268_v44 = vmax.f32 %v266_v40, %v267_v42  ;;  %959 = vmatpush1.msra.mxu1 %v226_v37 }
  0xfd   :  { %v271_v45 = vsub.f32 %v257_v28, %v264_v43  ;;  %v269_v46 = vrot.slane %v268_v44, 1 }
  0xff   :  { %v273_v47 = vmul.f32 1.442695, %v271_v45  ;;  %v270_v48 = vmax.f32 %v268_v44, %v269_v46 }
 0x101   :  { %1389 = vpow2.f32 %v273_v47  ;;  %v272_v49 = vsub.f32 %v258_v36, %v270_v48 }
 0x103   :  { %v275_v50 = vmul.f32 1.442695, %v272_v49 }
 0x105   :  { %1391 = vpow2.f32 %v275_v50 }
 0x10e   :  { %v1390_v51 = vpop.eup %1389 }
 0x10f   :  { %v277_v52 = vsel %vm1597_vm1, %v1390_v51, 0.0 }
 0x110   :  { %v279_v53 = vrot.slane %v277_v52, 4 }
 0x112   :  { %v1392_v54 = vpop.eup %1391  ;;  %v280_v55 = vadd.f32 %v279_v53, %v277_v52 }
 0x113   :  { %v278_v56 = vsel %vm1604_vm2, %v1392_v54, 0.0 }
 0x114   :  { %v281_v57 = vrot.slane %v280_v55, 2  ;;  %v285_v58 = vrot.slane %v278_v56, 4 }
 0x116   :  { %v282_v59 = vadd.f32 %v281_v57, %v280_v55  ;;  %v286_v60 = vadd.f32 %v285_v58, %v278_v56 }
 0x118   :  { %v283_v61 = vrot.slane %v282_v59, 1  ;;  %v287_v62 = vrot.slane %v286_v60, 2 }
 0x11a   :  { %v284_v63 = vadd.f32 %v283_v61, %v282_v59  ;;  %v288_v1 = vadd.f32 %v287_v62, %v286_v60 }
 0x11c   :  { %v291_v2 = vmax.f32 %v284_v63, 1e-30  ;;  %v289_v3 = vrot.slane %v288_v1, 1 }
 0x11e   :  { %1393 = vrcp.f32 %v291_v2  ;;  %v290_v4 = vadd.f32 %v289_v3, %v288_v1 }
 0x120   :  { %v292_v5 = vmax.f32 %v290_v4, 1e-30 }
 0x122   :  { %1395 = vrcp.f32 %v292_v5 }
 0x12b   :  { %v1394_v6 = vpop.eup %1393 }
 0x12c   :  { %v295_v7 = vmul.f32 %v1394_v6, %v291_v2 }
 0x12e   :  { %v297_v8 = vsub.f32 2.0, %v295_v7 }
 0x12f   :  { %v1396_v9 = vpop.eup %1395 }
 0x130   :  { %v299_v10 = vmul.f32 %v1394_v6, %v297_v8  ;;  %v296_v11 = vmul.f32 %v1396_v9, %v292_v5  ;;  %v1361_v8 = vld [vmem:[%s1755_s3 + $0x2] ss:$0 sm:$0xff] }
 0x132   :  { %v301_v12 = vmul.f32 %v299_v10, %v277_v52  ;;  %v298_v13 = vsub.f32 2.0, %v296_v11 }
 0x134   :  { %v305_v14 = vmul.f32 %v301_v12, %v145_v27  ;;  %303 = vst [vmem:[#allocation12] sm:$0xff] %v301_v12  ;;  %v300_v15 = vmul.f32 %v1396_v9, %v298_v13  ;;  %365 = vxpose.xlu0.b32.start.end [1/1] (short) %v301_v12, 128  ;;  %v1344_v27 = vld [vmem:[%s1755_s3 + $0x1] ss:$0 sm:$0xff] }
 0x136   :  { %v307_v16 = vrot.slane %v305_v14, 4  ;;  %v302_v17 = vmul.f32 %v300_v15, %v278_v56 }
 0x138   :  { %v308_v19 = vadd.f32 %v307_v16, %v305_v14  ;;  %v306_v21 = vmul.f32 %v302_v17, %v151_v18  ;;  %304 = vst [vmem:[#allocation12 + $0x8] sm:$0xff] %v302_v17 }
 0x13a   :  { %v309_v22 = vrot.slane %v308_v19, 2  ;;  %v313_v23 = vrot.slane %v306_v21, 4 }
 0x13c   :  { %v310_v24 = vadd.f32 %v309_v22, %v308_v19  ;;  %v314_v25 = vadd.f32 %v313_v23, %v306_v21 }
 0x13e   :  { %v315_v26 = vrot.slane %v314_v25, 2  ;;  %v311_v28 = vrot.slane %v310_v24, 1 }
 0x140   :  { %v316_v29 = vadd.f32 %v315_v26, %v314_v25  ;;  %v312_v31 = vadd.f32 %v311_v28, %v310_v24 }
 0x142   :  { %v317_v30 = vrot.slane %v316_v29, 1  ;;  %v325_v34 = vadd.f32 %v1344_v27, %v312_v31 }
 0x144   :  { %v318_v32 = vadd.f32 %v317_v30, %v316_v29 }
 0x146   :  { %v326_v33 = vadd.f32 %v1344_v27, %v318_v32 }
 0x148   :  { %v329_v35 = vrot.slane %v326_v33, 7 }
 0x14a   :  { %v331_v36 = vsel %vm330_vm3, %v329_v35, %v325_v34 }
 0x14b   :  { %333 = vst [vmem:[#allocation9] sm:$0x3] %v331_v36 }
 0x171   :  { %848 = vxpose.xlu0.b32.start.end [1/1] (short) %v302_v17, 128 }
 0x1b0   :  { %v381_v39 = vpop.trf.xlu0 }
 0x1b1   :  { %1345 = vmatmul.mubr.msk.f32.vlgmr.msra.gmra.mxu0 %vm397_vm4, %v381_v39 }
 0x1b2   :  { %516 = vmatprep.mubr.f32.mxu0 %v1530_v0 }
 0x1b4   :  { %v382_v40 = vpop.trf.xlu0 }
 0x1b5   :  { %1346 = vmatmul.mubr.msk.f32.gmra.mxu0 %vm397_vm4, %v382_v40 }
 0x1b6   :  { %522 = vmatprep.mubr.f32.mxu0 %v1530_v0 }
 0x1b8   :  { %v383_v41 = vpop.trf.xlu0 }
 0x1b9   :  { %1347 = vmatmul.mubr.msk.f32.gmra.mxu0 %vm397_vm4, %v383_v41 }
 0x1ba   :  { %528 = vmatprep.mubr.f32.mxu0 %v1530_v0 }
 0x1bc   :  { %v384_v42 = vpop.trf.xlu0 }
 0x1bd   :  { %1348 = vmatmul.mubr.msk.f32.gmra.mxu0 %vm397_vm4, %v384_v42 }
 0x1be   :  { %534 = vmatprep.mubr.f32.mxu0 %v1530_v0 }
 0x1c0   :  { %v385_v43 = vpop.trf.xlu0 }
 0x1c1   :  { %1349 = vmatmul.mubr.msk.f32.gmra.mxu0 %vm397_vm4, %v385_v43 }
 0x1c2   :  { %540 = vmatprep.mubr.f32.mxu0 %v1530_v0 }
 0x1c4   :  { %v386_v44 = vpop.trf.xlu0 }
 0x1c5   :  { %1350 = vmatmul.mubr.msk.f32.gmra.mxu0 %vm397_vm4, %v386_v44 }
 0x1c6   :  { %546 = vmatprep.mubr.f32.mxu0 %v1530_v0 }
 0x1c8   :  { %v387_v45 = vpop.trf.xlu0 }
 0x1c9   :  { %1351 = vmatmul.mubr.msk.f32.gmra.mxu0 %vm397_vm4, %v387_v45 }
 0x1ca   :  { %552 = vmatprep.mubr.f32.mxu0 %v1530_v0 }
 0x1cc   :  { %v388_v46 = vpop.trf.xlu0 }
 0x1cd   :  { %1352 = vmatmul.mubr.msk.f32.gmra.mxu0 %vm397_vm4, %v388_v46 }
 0x1ce   :  { %558 = vmatprep.mubr.f32.mxu0 %v1530_v0 }
 0x1d0   :  { %v389_v47 = vpop.trf.xlu0 }
 0x1d1   :  { %1353 = vmatmul.mubr.msk.f32.gmra.mxu0 %vm397_vm4, %v389_v47 }
 0x1d2   :  { %564 = vmatprep.mubr.f32.mxu0 %v1530_v0 }
 0x1d4   :  { %v390_v48 = vpop.trf.xlu0 }
 0x1d5   :  { %1354 = vmatmul.mubr.msk.f32.gmra.mxu0 %vm397_vm4, %v390_v48 }
 0x1d6   :  { %570 = vmatprep.mubr.f32.mxu0 %v1530_v0 }
 0x1d8   :  { %v391_v49 = vpop.trf.xlu0 }
 0x1d9   :  { %1355 = vmatmul.mubr.msk.f32.gmra.mxu0 %vm397_vm4, %v391_v49 }
 0x1da   :  { %576 = vmatprep.mubr.f32.mxu0 %v1530_v0 }
 0x1dc   :  { %v392_v50 = vpop.trf.xlu0 }
 0x1dd   :  { %1356 = vmatmul.mubr.msk.f32.gmra.mxu0 %vm397_vm4, %v392_v50 }
 0x1de   :  { %582 = vmatprep.mubr.f32.mxu0 %v1530_v0 }
 0x1e0   :  { %v393_v51 = vpop.trf.xlu0 }
 0x1e1   :  { %1357 = vmatmul.mubr.msk.f32.gmra.mxu0 %vm397_vm4, %v393_v51 }
 0x1e2   :  { %588 = vmatprep.mubr.f32.mxu0 %v1530_v0 }
 0x1e4   :  { %v394_v52 = vpop.trf.xlu0 }
 0x1e5   :  { %1358 = vmatmul.mubr.msk.f32.gmra.mxu0 %vm397_vm4, %v394_v52 }
 0x1e6   :  { %594 = vmatprep.mubr.f32.mxu0 %v1530_v0 }
 0x1e8   :  { %v395_v53 = vpop.trf.xlu0 }
 0x1e9   :  { %1359 = vmatmul.mubr.msk.f32.gmra.mxu0 %vm397_vm4, %v395_v53 }
 0x1ea   :  { %600 = vmatprep.mubr.f32.mxu0 %v1530_v0 }
 0x1ec   :  { %v396_v54 = vpop.trf.xlu0 }
 0x1ed   :  { %1360 = vmatmul.mubr.msk.f32.gmra.mxu0 %vm397_vm4, %v396_v54 }
 0x1f0   :  { %v864_v55 = vpop.trf.xlu0 }
 0x1f1   :  { %1362 = vmatmul.mubr.msk.f32.vlgmr.msra.gmra.mxu1 %vm397_vm4, %v864_v55 }
 0x1f2   :  { %998 = vmatprep.mubr.f32.mxu1 %v1530_v0 }
 0x1f4   :  { %v865_v56 = vpop.trf.xlu0 }
 0x1f5   :  { %1363 = vmatmul.mubr.msk.f32.gmra.mxu1 %vm397_vm4, %v865_v56 }
 0x1f6   :  { %1004 = vmatprep.mubr.f32.mxu1 %v1530_v0 }
 0x1f8   :  { %v866_v57 = vpop.trf.xlu0 }
 0x1f9   :  { %1364 = vmatmul.mubr.msk.f32.gmra.mxu1 %vm397_vm4, %v866_v57 }
 0x1fa   :  { %1010 = vmatprep.mubr.f32.mxu1 %v1530_v0 }
 0x1fc   :  { %v867_v58 = vpop.trf.xlu0 }
 0x1fd   :  { %1365 = vmatmul.mubr.msk.f32.gmra.mxu1 %vm397_vm4, %v867_v58 }
 0x1fe   :  { %1016 = vmatprep.mubr.f32.mxu1 %v1530_v0 }
 0x200   :  { %v868_v59 = vpop.trf.xlu0 }
 0x201   :  { %1366 = vmatmul.mubr.msk.f32.gmra.mxu1 %vm397_vm4, %v868_v59 }
 0x202   :  { %1022 = vmatprep.mubr.f32.mxu1 %v1530_v0 }
 0x204   :  { %v869_v60 = vpop.trf.xlu0 }
 0x205   :  { %1367 = vmatmul.mubr.msk.f32.gmra.mxu1 %vm397_vm4, %v869_v60 }
 0x206   :  { %1028 = vmatprep.mubr.f32.mxu1 %v1530_v0 }
 0x208   :  { %v870_v61 = vpop.trf.xlu0 }
 0x209   :  { %1368 = vmatmul.mubr.msk.f32.gmra.mxu1 %vm397_vm4, %v870_v61 }
 0x20a   :  { %1034 = vmatprep.mubr.f32.mxu1 %v1530_v0 }
 0x20c   :  { %v871_v62 = vpop.trf.xlu0 }
 0x20d   :  { %1369 = vmatmul.mubr.msk.f32.gmra.mxu1 %vm397_vm4, %v871_v62 }
 0x20e   :  { %1040 = vmatprep.mubr.f32.mxu1 %v1530_v0 }
 0x210   :  { %v872_v63 = vpop.trf.xlu0 }
 0x211   :  { %1370 = vmatmul.mubr.msk.f32.gmra.mxu1 %vm397_vm4, %v872_v63 }
 0x212   :  { %1046 = vmatprep.mubr.f32.mxu1 %v1530_v0 }
 0x214   :  { %v873_v1 = vpop.trf.xlu0 }
 0x215   :  { %1371 = vmatmul.mubr.msk.f32.gmra.mxu1 %vm397_vm4, %v873_v1 }
 0x216   :  { %1052 = vmatprep.mubr.f32.mxu1 %v1530_v0 }
 0x218   :  { %v874_v2 = vpop.trf.xlu0 }
 0x219   :  { %1372 = vmatmul.mubr.msk.f32.gmra.mxu1 %vm397_vm4, %v874_v2 }
 0x21a   :  { %1058 = vmatprep.mubr.f32.mxu1 %v1530_v0 }
 0x21c   :  { %v875_v3 = vpop.trf.xlu0 }
 0x21d   :  { %1373 = vmatmul.mubr.msk.f32.gmra.mxu1 %vm397_vm4, %v875_v3 }
 0x21e   :  { %1064 = vmatprep.mubr.f32.mxu1 %v1530_v0 }
 0x220   :  { %v876_v4 = vpop.trf.xlu0 }
 0x221   :  { %1374 = vmatmul.mubr.msk.f32.gmra.mxu1 %vm397_vm4, %v876_v4 }
 0x222   :  { %1070 = vmatprep.mubr.f32.mxu1 %v1530_v0 }
 0x224   :  { %v877_v5 = vpop.trf.xlu0 }
 0x225   :  { %1375 = vmatmul.mubr.msk.f32.gmra.mxu1 %vm397_vm4, %v877_v5 }
 0x226   :  { %1076 = vmatprep.mubr.f32.mxu1 %v1530_v0 }
 0x228   :  { %v878_v6 = vpop.trf.xlu0 }
 0x229   :  { %1376 = vmatmul.mubr.msk.f32.gmra.mxu1 %vm397_vm4, %v878_v6 }
 0x22a   :  { %1082 = vmatprep.mubr.f32.mxu1 %v1530_v0 }
 0x22c   :  { %v879_v7 = vpop.trf.xlu0 }
 0x22d   :  { %1377 = vmatmul.mubr.msk.f32.gmra.mxu1 %vm397_vm4, %v879_v7 }
 0x271   :  { %v512_v9 = vpop.f32.mrf.mxu0 }
 0x272   :  { %v613_v10 = vadd.f32 %v1361_v8, %v512_v9 }
 0x273   :  { %v1682_v11 = vpop.f32.mrf.mxu0 }
 0x274   :  { %v677_v12 = vmax.f32 %v613_v10, -1e+30 }
 0x275   :  { %v518_v13 = vpop.f32.mrf.mxu0 }
 0x276   :  { %v681_v14 = vmax.f32 %v677_v12, -1e+30 }
 0x277   :  { %v1684_v15 = vpop.f32.mrf.mxu0 }
 0x278   :  { %v685_v16 = vmax.f32 %v681_v14, -1e+30 }
 0x279   :  { %v524_v17 = vpop.f32.mrf.mxu0 }
 0x27a   :  { %v689_v18 = vmax.f32 %v685_v16, -1e+30 }
 0x27b   :  { %v1686_v0 = vpop.f32.mrf.mxu0 }
 0x27c   :  { %v691_v19 = vmax.f32 %v689_v18, -1e+30 }
 0x27d   :  { %v530_v21 = vpop.f32.mrf.mxu0 }
 0x27e   :  { %v692_v22 = vrot.slane %v691_v19, 4 }
 0x27f   :  { %v1688_v23 = vpop.f32.mrf.mxu0 }
 0x280   :  { %v693_v24 = vmax.f32 %v691_v19, %v692_v22 }
 0x281   :  { %v536_v25 = vpop.f32.mrf.mxu0 }
 0x282   :  { %v694_v26 = vrot.slane %v693_v24, 2 }
 0x283   :  { %v1690_v28 = vpop.f32.mrf.mxu0 }
 0x284   :  { %v695_v29 = vmax.f32 %v693_v24, %v694_v26 }
 0x285   :  { %v542_v30 = vpop.f32.mrf.mxu0 }
 0x286   :  { %v696_v31 = vrot.slane %v695_v29, 1 }
 0x287   :  { %v1692_v32 = vpop.f32.mrf.mxu0 }
 0x288   :  { %v697_v27 = vmax.f32 %v695_v29, %v696_v31 }
 0x289   :  { %v548_v33 = vpop.f32.mrf.mxu0 }
 0x28a   :  { %v698_v34 = vsub.f32 %v613_v10, %v697_v27 }
 0x28b   :  { %v1694_v35 = vpop.f32.mrf.mxu0 }
 0x28c   :  { %v714_v36 = vmul.f32 1.442695, %v698_v34 }
 0x28d   :  { %v554_v37 = vpop.f32.mrf.mxu0 }
 0x28e   :  { %1397 = vpow2.f32 %v714_v36 }
 0x28f   :  { %v1696_v38 = vpop.f32.mrf.mxu0 }
 0x291   :  { %v560_v39 = vpop.f32.mrf.mxu0 }
 0x293   :  { %v1698_v40 = vpop.f32.mrf.mxu0 }
 0x295   :  { %v566_v41 = vpop.f32.mrf.mxu0 }
 0x297   :  { %v1700_v42 = vpop.f32.mrf.mxu0 }
 0x299   :  { %v572_v43 = vpop.f32.mrf.mxu0 }
 0x29b   :  { %v1398_v44 = vpop.eup %1397  ;;  %v574_v45 = vpop.f32.mrf.mxu0 }
 0x29c   :  { %v777_v46 = vrot.slane %v1398_v44, 4 }
 0x29d   :  { %v578_v47 = vpop.f32.mrf.mxu0 }
 0x29e   :  { %v778_v48 = vadd.f32 %v1398_v44, %v777_v46 }
 0x29f   :  { %v580_v49 = vpop.f32.mrf.mxu0 }
 0x2a0   :  { %v779_v50 = vrot.slane %v778_v48, 2 }
 0x2a1   :  { %v584_v51 = vpop.f32.mrf.mxu0 }
 0x2a2   :  { %v780_v52 = vadd.f32 %v779_v50, %v778_v48 }
 0x2a3   :  { %v586_v53 = vpop.f32.mrf.mxu0 }
 0x2a4   :  { %v781_v54 = vrot.slane %v780_v52, 1 }
 0x2a5   :  { %v590_v55 = vpop.f32.mrf.mxu0 }
 0x2a6   :  { %v782_v56 = vadd.f32 %v781_v54, %v780_v52 }
 0x2a7   :  { %v592_v57 = vpop.f32.mrf.mxu0 }
 0x2a8   :  { %v783_v58 = vmax.f32 %v782_v56, 1e-30 }
 0x2a9   :  { %v596_v59 = vpop.f32.mrf.mxu0 }
 0x2aa   :  { %1399 = vrcp.f32 %v783_v58 }
 0x2ab   :  { %v598_v60 = vpop.f32.mrf.mxu0 }
 0x2ad   :  { %v602_v61 = vpop.f32.mrf.mxu0 }
 0x2b1   :  { %v994_v62 = vpop.f32.mrf.mxu1 }
 0x2b2   :  { %v1702_v63 = vadd.f32 %v1361_v8, %v994_v62 }
 0x2b3   :  { %v1704_v1 = vpop.f32.mrf.mxu1 }
 0x2b4   :  { %v1121_v2 = vmax.f32 %v1702_v63, -1e+30 }
 0x2b5   :  { %v1000_v3 = vpop.f32.mrf.mxu1 }
 0x2b6   :  { %v1125_v4 = vmax.f32 %v1121_v2, -1e+30 }
 0x2b7   :  { %v1400_v5 = vpop.eup %1399  ;;  %v1707_v6 = vpop.f32.mrf.mxu1 }
 0x2b8   :  { %v785_v7 = vmul.f32 %v1400_v5, %v783_v58  ;;  %v1129_v9 = vmax.f32 %v1125_v4, -1e+30 }
 0x2b9   :  { %v1006_v10 = vpop.f32.mrf.mxu1 }
 0x2ba   :  { %1464 = shalt.err (!%p1461_p0)
}
 0x2bb   :  { %1302 = dma.vmem_to_hbm [thread:$0]  %s1300_s20, 32, %s1756_s4, [#allocation6]   ;;  %v786_v8 = vsub.f32 2.0, %v785_v7  ;;  %v1133_v12 = vmax.f32 %v1129_v9, -1e+30  ;;  %v1712_v13 = vpop.f32.mrf.mxu1  ;;  %v604_v9 = vpop.f32.mrf.mxu0  ;;  %vm842_vm5 = vcmp.eq.s32.totalorder %v1591_v20, 0 }
 0x2bc   :  { %s1532_s25 = smov [#allocation10]   ;;  %vm1286_vm6 = vcmp.eq.s32.totalorder %v1591_v20, 1  ;;  %s1533_s0 = smov [#allocation12]  }
 0x2bd   :  { %v787_v14 = vmul.f32 %v1400_v5, %v786_v8  ;;  %v1135_v16 = vmax.f32 %v1133_v12, -1e+30  ;;  %v1012_v17 = vpop.f32.mrf.mxu1  ;;  %s1309_s26 = sshll.u32 %s1532_s25, 4  ;;  %s1318_s29 = sshll.u32 %s1533_s0, 4  ;;  %s1310_s26 = int_to_ptr.vmem [resolvable:$true] %s1309_s26  ;;  %s1319_s29 = int_to_ptr.vmem [resolvable:$true] %s1318_s29 }
 0x2be   :  { %p1478_p2 = scmp.lt.s32.totalorder %s1310_s26, %s1310_s26 }
 0x2bf   :  { %v788_v18 = vmul.f32 %v1398_v44, %v787_v14  ;;  %v789_v19 = vmul.f32 0.0, %v787_v14  ;;  %v1136_v21 = vrot.slane %v1135_v16, 4  ;;  %v1714_v22 = vpop.f32.mrf.mxu1 }
 0x2c1   :  { %v804_v24 = vmul.f32 %v788_v18, %v1682_v11  ;;  %v805_v25 = vmul.f32 %v789_v19, %v1684_v15  ;;  %v806_v26 = vmul.f32 %v789_v19, %v1686_v0  ;;  %v807_v29 = vmul.f32 %v789_v19, %v1688_v23  ;;  %v1018_v34 = vpop.f32.mrf.mxu1 }
 0x2c2   :  { %v808_v30 = vmul.f32 %v789_v19, %v1690_v28  ;;  %v809_v31 = vmul.f32 %v789_v19, %v1692_v32  ;;  %v810_v27 = vmul.f32 %v789_v19, %v1694_v35  ;;  %v811_v33 = vmul.f32 %v789_v19, %v1696_v38 }
 0x2c3   :  { %v820_v36 = vadd.f32 %v805_v25, %v804_v24  ;;  %v812_v37 = vmul.f32 %v789_v19, %v1698_v40  ;;  %v813_v11 = vmul.f32 %v789_v19, %v1700_v42  ;;  %v814_v39 = vmul.f32 %v789_v19, %v574_v45  ;;  %v1726_v23 = vpop.f32.mrf.mxu1 }
 0x2c4   :  { %v815_v15 = vmul.f32 %v789_v19, %v580_v49  ;;  %v816_v41 = vmul.f32 %v789_v19, %v586_v53  ;;  %v817_v0 = vmul.f32 %v789_v19, %v592_v57  ;;  %v818_v43 = vmul.f32 %v789_v19, %v598_v60 }
 0x2c5   :  { %v821_v28 = vadd.f32 %v820_v36, %v806_v26  ;;  %v1137_v44 = vmax.f32 %v1135_v16, %v1136_v21  ;;  %v1024_v32 = vpop.f32.mrf.mxu1  ;;  %v819_v12 = vmul.f32 %v789_v19, %v604_v9 }
 0x2c7   :  { %v822_v46 = vadd.f32 %v821_v28, %v807_v29  ;;  %v1138_v35 = vrot.slane %v1137_v44, 2  ;;  %v1728_v47 = vpop.f32.mrf.mxu1 }
 0x2c9   :  { %v823_v38 = vadd.f32 %v822_v46, %v808_v30  ;;  %v1139_v48 = vmax.f32 %v1137_v44, %v1138_v35  ;;  %v1030_v50 = vpop.f32.mrf.mxu1 }
 0x2cb   :  { %v824_v40 = vadd.f32 %v823_v38, %v809_v31  ;;  %v1140_v51 = vrot.slane %v1139_v48, 1  ;;  %v1032_v42 = vpop.f32.mrf.mxu1 }
 0x2cd   :  { %v825_v45 = vadd.f32 %v824_v40, %v810_v27  ;;  %v1141_v49 = vmax.f32 %v1139_v48, %v1140_v51  ;;  %v1036_v52 = vpop.f32.mrf.mxu1 }
 0x2cf   :  { %v826_v53 = vadd.f32 %v825_v45, %v811_v33  ;;  %v1142_v54 = vsub.f32 %v1702_v63, %v1141_v49  ;;  %v1038_v55 = vpop.f32.mrf.mxu1 }
 0x2d1   :  { %v827_v56 = vadd.f32 %v826_v53, %v812_v37  ;;  %v1158_v57 = vmul.f32 1.442695, %v1142_v54  ;;  %v1042_v58 = vpop.f32.mrf.mxu1 }
 0x2d3   :  { %v828_v59 = vadd.f32 %v827_v56, %v813_v11  ;;  %1401 = vpow2.f32 %v1158_v57  ;;  %v1044_v60 = vpop.f32.mrf.mxu1 }
 0x2d5   :  { %v829_v61 = vadd.f32 %v828_v59, %v814_v39  ;;  %v1048_v62 = vpop.f32.mrf.mxu1 }
 0x2d7   :  { %v830_v2 = vadd.f32 %v829_v61, %v815_v15  ;;  %v1050_v3 = vpop.f32.mrf.mxu1 }
 0x2d9   :  { %v831_v4 = vadd.f32 %v830_v2, %v816_v41  ;;  %v1054_v5 = vpop.f32.mrf.mxu1 }
 0x2db   :  { %v832_v7 = vadd.f32 %v831_v4, %v817_v0  ;;  %v1056_v10 = vpop.f32.mrf.mxu1 }
 0x2dd   :  { %v833_v8 = vadd.f32 %v832_v7, %v818_v43  ;;  %v1060_v14 = vpop.f32.mrf.mxu1 }
 0x2df   :  { %v834_v63 = vadd.f32 %v833_v8, %v819_v12  ;;  %v1062_v17 = vpop.f32.mrf.mxu1 }
 0x2e0   :  { %v1402_v16 = vpop.eup %1401 }
 0x2e1   :  { %v1221_v18 = vrot.slane %v1402_v16, 4  ;;  %v1066_v21 = vpop.f32.mrf.mxu1  ;;  %v835_v56 = vrot.slane %v834_v63, 4 }
 0x2e2   :  { %v845_v21 = vsub.s32 0, %v1591_v20 }
 0x2e3   :  { %v1222_v24 = vadd.f32 %v1402_v16, %v1221_v18  ;;  %v1068_v25 = vpop.f32.mrf.mxu1  ;;  %v836_v59 = vadd.f32 %v835_v56, %v834_v63  ;;  %v242_v63 = vld [vmem:[%s1755_s3 + $0x3] sm:$0x1]  ;;  %s1473_s3 = scalar_lea.vmem %s1310_s26, 32 }
 0x2e4   :  { %p1474_p1 = scmp.ne.s32.totalorder %s1310_s26, %s1473_s3  ;;  %p1479_p3 = scmp.lt.s32.totalorder %s1473_s3, %s1473_s3 }
 0x2e5   :  { %v1223_v26 = vrot.slane %v1222_v24, 2  ;;  %v1072_v29 = vpop.f32.mrf.mxu1 }
 0x2e6   :  { %p1480_p4 = por %p1479_p3, %p1478_p2 }
 0x2e7   :  { %v1224_v30 = vadd.f32 %v1223_v26, %v1222_v24  ;;  %v1074_v31 = vpop.f32.mrf.mxu1 }
 0x2e8   :  { %p1481_p5 = pnand %p1480_p4, %p1474_p1 }
 0x2e9   :  { %v1225_v27 = vrot.slane %v1224_v30, 1  ;;  %v1078_v33 = vpop.f32.mrf.mxu1 }
 0x2eb   :  { %v1226_v34 = vadd.f32 %v1225_v27, %v1224_v30  ;;  %v1080_v36 = vpop.f32.mrf.mxu1 }
 0x2ed   :  { %v1227_v37 = vmax.f32 %v1226_v34, 1e-30  ;;  %v1084_v11 = vpop.f32.mrf.mxu1 }
 0x2ef   :  { %1403 = vrcp.f32 %v1227_v37 }
 0x2fc   :  { %v1404_v19 = vpop.eup %1403 }
 0x2fd   :  { %v1229_v39 = vmul.f32 %v1404_v19, %v1227_v37 }
 0x2ff   :  { %v1230_v15 = vsub.f32 2.0, %v1229_v39 }
 0x301   :  { %v1231_v41 = vmul.f32 %v1404_v19, %v1230_v15 }
 0x303   :  { %v1232_v0 = vmul.f32 %v1402_v16, %v1231_v41  ;;  %v1233_v43 = vmul.f32 0.0, %v1231_v41 }
 0x305   :  { %v1248_v28 = vmul.f32 %v1232_v0, %v1704_v1  ;;  %v1249_v44 = vmul.f32 %v1233_v43, %v1707_v6  ;;  %v1250_v46 = vmul.f32 %v1233_v43, %v1712_v13  ;;  %v1251_v38 = vmul.f32 %v1233_v43, %v1714_v22 }
 0x306   :  { %v1252_v50 = vmul.f32 %v1233_v43, %v1726_v23  ;;  %v1253_v51 = vmul.f32 %v1233_v43, %v1728_v47  ;;  %v1254_v49 = vmul.f32 %v1233_v43, %v1032_v42  ;;  %v1255_v53 = vmul.f32 %v1233_v43, %v1038_v55  ;;  %v1086_v47 = vpop.f32.mrf.mxu1 }
 0x307   :  { %v1264_v32 = vadd.f32 %v1249_v44, %v1248_v28  ;;  %v1256_v1 = vmul.f32 %v1233_v43, %v1044_v60  ;;  %v1257_v57 = vmul.f32 %v1233_v43, %v1050_v3  ;;  %v1258_v13 = vmul.f32 %v1233_v43, %v1056_v10 }
 0x308   :  { %v1259_v22 = vmul.f32 %v1233_v43, %v1062_v17  ;;  %v1260_v2 = vmul.f32 %v1233_v43, %v1068_v25  ;;  %v837_v23 = vrot.slane %v836_v59, 2  ;;  %v1261_v5 = vmul.f32 %v1233_v43, %v1074_v31 }
 0x309   :  { %v1265_v35 = vadd.f32 %v1264_v32, %v1250_v46  ;;  %v1262_v42 = vmul.f32 %v1233_v43, %v1080_v36  ;;  %v1263_v8 = vmul.f32 %v1233_v43, %v1086_v47 }
 0x30a   :  { %v838_v9 = vadd.f32 %v837_v23, %v836_v59 }
 0x30b   :  { %v1266_v48 = vadd.f32 %v1265_v35, %v1251_v38 }
 0x30c   :  { %v839_v12 = vrot.slane %v838_v9, 1 }
 0x30d   :  { %v1267_v40 = vadd.f32 %v1266_v48, %v1252_v50 }
 0x30e   :  { %v840_v16 = vadd.f32 %v839_v12, %v838_v9 }
 0x30f   :  { %v1268_v45 = vadd.f32 %v1267_v40, %v1253_v51 }
 0x310   :  { %v841_v18 = vadd.f32 %v840_v16, %v242_v63 }
 0x311   :  { %v1269_v52 = vadd.f32 %v1268_v45, %v1254_v49 }
 0x312   :  { %v846_v26 = vrot.slane %v841_v18, %v845_v21 }
 0x313   :  { %v1270_v54 = vadd.f32 %v1269_v52, %v1255_v53 }
 0x314   :  { %v847_v31 = vsel %vm842_vm5, %v846_v26, 0.0 }
 0x315   :  { %v1271_v6 = vadd.f32 %v1270_v54, %v1256_v1 }
 0x317   :  { %v1272_v58 = vadd.f32 %v1271_v6, %v1257_v57 }
 0x319   :  { %v1273_v61 = vadd.f32 %v1272_v58, %v1258_v13 }
 0x31b   :  { %v1274_v62 = vadd.f32 %v1273_v61, %v1259_v22 }
 0x31d   :  { %v1275_v4 = vadd.f32 %v1274_v62, %v1260_v2 }
 0x31f   :  { %v1276_v7 = vadd.f32 %v1275_v4, %v1261_v5 }
 0x321   :  { %v1277_v55 = vadd.f32 %v1276_v7, %v1262_v42 }
 0x323   :  { %v1278_v60 = vadd.f32 %v1277_v55, %v1263_v8 }
 0x325   :  { %v1279_v14 = vrot.slane %v1278_v60, 4 }
 0x327   :  { %v1280_v3 = vadd.f32 %v1279_v14, %v1278_v60 }
 0x329   :  { %v1281_v10 = vrot.slane %v1280_v3, 2 }
 0x32b   :  { %v1282_v17 = vadd.f32 %v1281_v10, %v1280_v3 }
 0x32d   :  { %v1283_v24 = vrot.slane %v1282_v17, 1 }
 0x32f   :  { %v1284_v25 = vadd.f32 %v1283_v24, %v1282_v17 }
 0x331   :  { %v1285_v29 = vadd.f32 %v1284_v25, %v242_v63 }
 0x333   :  { %v1290_v30 = vrot.slane %v1285_v29, %v845_v21 }
 0x335   :  { %v1291_v27 = vsel %vm1286_vm6, %v1290_v30, %v847_v31 }
 0x336   :  { %1292 = vst [vmem:[#allocation10] sm:$0x3] %v1291_v27 }
 0x337   :  { %1484 = shalt.err (!%p1481_p5)
}
 0x338   :  { %1312 = dma.vmem_to_hbm [thread:$0]  %s1310_s26, 32, %s1757_s5, [#allocation11]  }
 0x339   :  { %s1493_s8 = scalar_lea.vmem %s1319_s29, 256  ;;  %p1498_p7 = scmp.lt.s32.totalorder %s1319_s29, %s1319_s29 }
 0x33a   :  { %p1494_p6 = scmp.ne.s32.totalorder %s1319_s29, %s1493_s8  ;;  %p1499_p8 = scmp.lt.s32.totalorder %s1493_s8, %s1493_s8 }
 0x33c   :  { %p1500_p9 = por %p1499_p8, %p1498_p7 }
 0x33e   :  { %p1501_p10 = pnand %p1500_p9, %p1494_p6 }
 0x340   :  { %1504 = shalt.err (!%p1501_p10)
}
 0x341   :  { %1324 = dma.vmem_to_hbm [thread:$0]  %s1319_s29, 256, %s1758_s6, [#allocation11], %s1525_s27, %s1525_s27, %s1526_s28  }
 0x342   :  { %1519 = dma.done.wait [#allocation6], 32  }
 0x343   :  { %1520 = vsyncadd [#allocation6], 4294967264 }
 0x344   :  { %1521 = dma.done.wait [#allocation11], 288  }
 0x345   :  { %1522 = vsyncadd [#allocation11], 4294967008 }
 0x346   :  { %1334 = vsyncpa [#allocation5], 1 }
 0x347   :  { %1335 = vsyncpa [#allocation8], 1 }
 0x348   :  { %1336 = vsyncpa [#allocation6], 1 }
 0x349   :  { %1337 = vsyncpa [#allocation11], 1 }

</bundles_post_ra>
